<compile_context>
chip_gen: v7x
topology: tpu7x:2x2x1
jax: 0.10.0
libtpu: 0.0.40
codegen_flags: <defaults>
</compile_context>

<pallas_src>
import functools

import jax
import jax.numpy as jnp
from jax.experimental import pallas as pl
from jax.experimental.pallas import tpu as pltpu

LANES = 128             # lane width (fast axis)
DEFAULT_TILE_R = 1024   # rows (sublane axis) per grid step
EPS = 1e-8


def _focal_loss_kernel(pred_ref, tgt_ref, out_ref, *, gamma, tile_r,
                       rows_valid, needs_mask):
    p = pred_ref[...].astype(jnp.float32)
    t = tgt_ref[...].astype(jnp.float32)

    lp = jnp.log(p + EPS)           # log(pred + eps)
    l1p = jnp.log(1.0 - p + EPS)    # log(1 - pred + eps)

    if gamma == 0.0:
        # pow(x, 0) == 1 -> drop both power factors entirely (2 EUP ops/elem).
        loss = -t * lp - (1.0 - t) * l1p
    elif float(gamma).is_integer() and 0.0 < gamma <= 4.0:
        # Small integer gamma -> repeated multiplies on the VPU (no extra EUP).
        g = int(gamma)
        loss = (-t * ((1.0 - p) ** g) * lp
                - (1.0 - t) * (p ** g) * l1p)
    else:
        # pow(x, g) = exp(g * log(x)); reuse the logs already computed
        # (4 transcendentals/elem instead of 6 with jnp.power).
        loss = (-t * jnp.exp(gamma * l1p) * lp
                - (1.0 - t) * jnp.exp(gamma * lp) * l1p)

    if needs_mask:
        # Only the ragged last tile reads out-of-bounds rows (garbage); zero
        # them.  This branch is resolved at trace time (no steady-state cost
        # when rows % tile_r == 0).
        i = pl.program_id(0)
        row = i * tile_r + jax.lax.broadcasted_iota(
            jnp.int32, (tile_r, LANES), 0)
        loss = jnp.where(row < rows_valid, loss, 0.0)

    # Pure-VPU reduction of the (tile_r, 128) tile to one (8, 128) vreg,
    # stored lane-dense into this step's own output block.
    out_ref[...] = loss.reshape(tile_r // 8, 8, LANES).sum(axis=0)


def focal_loss(pred, target, gamma=0.0, *, tile_rows=DEFAULT_TILE_R):
    """Mean focal loss over all elements (matches the PyTorch FocalLoss)."""
    assert pred.shape == target.shape, (pred.shape, target.shape)
    n_valid = int(pred.size)
    assert n_valid > 0

    p_flat = pred.reshape(-1)
    t_flat = target.reshape(-1)

    # Pad only a small tail so the flat stream reshapes to a lane-dense 2-D
    # slab with >= 8 rows.  Pad values (pred=1, target=1) contribute exactly 0
    # loss in f32, so they never need masking.  For typical aligned NCHW sizes
    # (multiple of 128) this is a no-op (no extra HBM pass).
    padded = max(pl.cdiv(n_valid, LANES) * LANES, 8 * LANES)
    if padded != n_valid:
        pad = padded - n_valid
        p_flat = jnp.pad(p_flat, (0, pad), constant_values=1)
        t_flat = jnp.pad(t_flat, (0, pad), constant_values=1)

    rows = padded // LANES
    p2d = p_flat.reshape(rows, LANES)
    t2d = t_flat.reshape(rows, LANES)

    # Largest multiple-of-8 row tile not exceeding the requested size or the
    # array itself (avoids block-shape > array-shape corner cases).
    tile_r = min(int(tile_rows), (rows // 8) * 8)
    num_steps = pl.cdiv(rows, tile_r)
    needs_mask = (rows % tile_r) != 0

    kernel = functools.partial(
        _focal_loss_kernel, gamma=float(gamma), tile_r=tile_r,
        rows_valid=rows, needs_mask=needs_mask)

    partials = pl.pallas_call(
        kernel,
        out_shape=jax.ShapeDtypeStruct((num_steps * 8, LANES), jnp.float32),
        grid_spec=pltpu.PrefetchScalarGridSpec(
            num_scalar_prefetch=0,
            grid=(num_steps,),
            in_specs=[
                pl.BlockSpec((tile_r, LANES), lambda i: (i, 0)),
                pl.BlockSpec((tile_r, LANES), lambda i: (i, 0)),
            ],
            out_specs=pl.BlockSpec((8, LANES), lambda i: (i, 0)),
        ),
        compiler_params=pltpu.CompilerParams(
            dimension_semantics=("parallel",)),
    )(p2d, t2d)

    # Tiny final reduction: one vreg-sized partial per grid step.
    return jnp.sum(partials) / jnp.float32(n_valid)


def focal_loss_ref(pred, target, gamma=0.0):
    pred = pred.astype(jnp.float32)
    target = target.astype(jnp.float32)
    return jnp.mean(
        -target * jnp.power(1.0 - pred, gamma) * jnp.log(pred + EPS)
        - (1.0 - target) * jnp.power(pred, gamma) * jnp.log(1.0 - pred + EPS))


if __name__ == "__main__":
    key = jax.random.PRNGKey(0)
    k1, k2 = jax.random.split(key)
    # pred: probabilities in (0,1); target: {0,1} labels.  Shape NCHW.
    shape = (2, 4, 16, 16)
    pred = jax.nn.sigmoid(jax.random.normal(k1, shape, dtype=jnp.float32))
    target = jax.random.bernoulli(k2, 0.5, shape).astype(jnp.float32)

    # Module default gamma = 0.
    out0 = jax.block_until_ready(focal_loss(pred, target, gamma=0.0))
    ref0 = focal_loss_ref(pred, target, gamma=0.0)
    assert jnp.allclose(out0, ref0, rtol=1e-5, atol=1e-6), (out0, ref0)

    # Common focal-loss setting gamma = 2 (exercises the specialized power path).
    out2 = jax.block_until_ready(focal_loss(pred, target, gamma=2.0))
    ref2 = focal_loss_ref(pred, target, gamma=2.0)
    assert jnp.allclose(out2, ref2, rtol=1e-4, atol=1e-6), (out2, ref2)

    print("KERNEL_OK")
</pallas_src>

<mosaic_0001>
module attributes {stable_mosaic.version = 11 : i64} {
  func.func @_focal_loss_kernel(%arg0: i32, %arg1: memref<16x128xf32, #tpu.memory_space<vmem>>, %arg2: memref<16x128xf32, #tpu.memory_space<vmem>>, %arg3: memref<8x128xf32, #tpu.memory_space<vmem>>) attributes {dimension_semantics = [#tpu.dimension_semantics<parallel>], iteration_bounds = array<i64: 1>, scalar_prefetch = 0 : i64, scratch_operands = 0 : i64, tpu.core_type = #tpu.core_type<tc>, window_params = [{transform_indices = @transform_0, window_bounds = array<i64: 16, 128>}, {transform_indices = @transform_1, window_bounds = array<i64: 16, 128>}, {transform_indices = @transform_2, window_bounds = array<i64: 8, 128>}]} {
    %c0 = arith.constant 0 : index
    %c0_0 = arith.constant 0 : index
    %0 = vector.load %arg1[%c0, %c0_0] : memref<16x128xf32, #tpu.memory_space<vmem>>, vector<16x128xf32>
    %c0_1 = arith.constant 0 : index
    %c0_2 = arith.constant 0 : index
    %1 = vector.load %arg2[%c0_1, %c0_2] : memref<16x128xf32, #tpu.memory_space<vmem>>, vector<16x128xf32>
    %cst = arith.constant 9.99999993E-9 : f32
    %2 = vector.broadcast %cst : f32 to vector<16x128xf32>
    %3 = arith.addf %0, %2 : vector<16x128xf32>
    %4 = math.log %3 : vector<16x128xf32>
    %cst_3 = arith.constant 1.000000e+00 : f32
    %5 = vector.broadcast %cst_3 : f32 to vector<16x128xf32>
    %6 = arith.subf %5, %0 : vector<16x128xf32>
    %cst_4 = arith.constant 9.99999993E-9 : f32
    %7 = vector.broadcast %cst_4 : f32 to vector<16x128xf32>
    %8 = arith.addf %6, %7 : vector<16x128xf32>
    %9 = math.log %8 : vector<16x128xf32>
    %cst_5 = arith.constant 0.000000e+00 : f32
    %10 = vector.broadcast %cst_5 : f32 to vector<16x128xf32>
    %11 = arith.subf %10, %1 : vector<16x128xf32>
    %12 = arith.mulf %11, %4 : vector<16x128xf32>
    %cst_6 = arith.constant 1.000000e+00 : f32
    %13 = vector.broadcast %cst_6 : f32 to vector<16x128xf32>
    %14 = arith.subf %13, %1 : vector<16x128xf32>
    %15 = arith.mulf %14, %9 : vector<16x128xf32>
    %16 = arith.subf %12, %15 : vector<16x128xf32>
    %17 = vector.shape_cast %16 : vector<16x128xf32> to vector<2x8x128xf32>
    %cst_7 = arith.constant dense<0.000000e+00> : vector<8x128xf32>
    %18 = vector.multi_reduction <add>, %17, %cst_7 [0] : vector<2x8x128xf32> to vector<8x128xf32>
    %c0_8 = arith.constant 0 : index
    %c0_9 = arith.constant 0 : index
    %19 = vector.load %arg3[%c0_8, %c0_9] : memref<8x128xf32, #tpu.memory_space<vmem>>, vector<8x128xf32>
    tpu.vector_store %arg3[%c0_8, %c0_9], %18 {strides = array<i32>} : memref<8x128xf32, #tpu.memory_space<vmem>>, vector<8x128xf32>,
    return
  }
  func.func @transform_0(%arg0: i32) -> (i32, i32) {
    %c0_i32 = arith.constant 0 : i32
    %c0_i32_0 = arith.constant 0 : i32
    return %arg0, %c0_i32 : i32, i32
  }
  func.func @transform_1(%arg0: i32) -> (i32, i32) {
    %c0_i32 = arith.constant 0 : i32
    %c0_i32_0 = arith.constant 0 : i32
    return %arg0, %c0_i32 : i32, i32
  }
  func.func @transform_2(%arg0: i32) -> (i32, i32) {
    %c0_i32 = arith.constant 0 : i32
    %c0_i32_0 = arith.constant 0 : i32
    return %arg0, %c0_i32 : i32, i32
  }
}

</mosaic_0001>

<bundles_post_ra>
// kernel: tpu_custom_call.1
= control target key start
LH: loop header
LB: loop body
LE: loop exit
PB: predicated region body
PF: predicated region fallthrough
CT: control target
= control target key end

     0   :  { %7 = vsyncpa [#allocation3], 0  ;;  %s227_s0 = inlined_call_operand.hbm [shape: f32[16,128], index: 0, kind: input, shape index: {}]   ;;  %s228_s1 = inlined_call_operand.hbm [shape: f32[16,128], index: 1, kind: input, shape index: {}]   ;;  %s229_s2 = inlined_call_operand.hbm [shape: f32[8,128], index: 2, kind: output, shape index: {}]  }
   0x1   :  { %8 = vsyncpa [#allocation6], 0 }
   0x2   :  { %9 = vsyncpa [#allocation4], 0  ;;  %s171_s9 = smov [#allocation2]   ;;  %s99_s13 = scalar_lea.hbm %s227_s0, 256 }
   0x3   :  { %s15_s10 = sshll.u32 %s171_s9, 4  ;;  %p100_p0 = scmp.ne.s32.totalorder %s227_s0, %s99_s13  ;;  %s16_s10 = int_to_ptr.vmem [resolvable:$true] %s15_s10 }
   0x4   :  { %p103_p1 = scmp.lt.u32.totalorder %s99_s13, %s227_s0 }
   0x6   :  { %p105_p2 = pnand %p103_p1, %p100_p0 }
   0x8   :  { %108 = shalt.err (!%p105_p2)
}
   0x9   :  { %s109_s18 = scalar_lea.vmem %s16_s10, 256  ;;  %p114_p4 = scmp.lt.s32.totalorder %s16_s10, %s16_s10 }
   0xa   :  { %p110_p3 = scmp.ne.s32.totalorder %s16_s10, %s109_s18  ;;  %p115_p5 = scmp.lt.s32.totalorder %s109_s18, %s109_s18 }
   0xc   :  { %p116_p6 = por %p115_p5, %p114_p4 }
   0xe   :  { %p117_p7 = pnand %p116_p6, %p110_p3 }
  0x10   :  { %120 = shalt.err (!%p117_p7)
}
  0x11   :  { %s172_s19 = smov 128   ;;  %s173_s20 = smov 8  }
  0x12   :  { %21 = dma.hbm_to_vmem [thread:$0]  %s227_s0, 256, %s16_s10, [#allocation3], %s172_s19, %s172_s19, %s173_s20  }
  0x13   :  { %s174_s23 = smov [#allocation5]   ;;  %s121_s27 = scalar_lea.hbm %s228_s1, 256 }
  0x14   :  { %s27_s24 = sshll.u32 %s174_s23, 4  ;;  %p122_p8 = scmp.ne.s32.totalorder %s228_s1, %s121_s27  ;;  %s28_s24 = int_to_ptr.vmem [resolvable:$true] %s27_s24 }
  0x15   :  { %p125_p9 = scmp.lt.u32.totalorder %s121_s27, %s228_s1 }
  0x17   :  { %p127_p10 = pnand %p125_p9, %p122_p8 }
  0x19   :  { %130 = shalt.err (!%p127_p10)
}
  0x1a   :  { %s131_s4 = scalar_lea.vmem %s28_s24, 256  ;;  %p136_p12 = scmp.lt.s32.totalorder %s28_s24, %s28_s24 }
  0x1b   :  { %p132_p11 = scmp.ne.s32.totalorder %s28_s24, %s131_s4  ;;  %p137_p13 = scmp.lt.s32.totalorder %s131_s4, %s131_s4 }
  0x1d   :  { %p138_p0 = por %p137_p13, %p136_p12 }
  0x1f   :  { %p139_p1 = pnand %p138_p0, %p132_p11 }
  0x21   :  { %142 = shalt.err (!%p139_p1)
}
  0x22   :  { %33 = dma.hbm_to_vmem [thread:$0]  %s228_s1, 256, %s28_s24, [#allocation6], %s172_s19, %s172_s19, %s173_s20  }
  0x23   :  { %165 = dma.done.wait [#allocation3], 256  }
  0x24   :  { %166 = vsyncadd [#allocation3], 4294967040 }
  0x25   :  { %167 = dma.done.wait [#allocation6], 256  }
  0x26   :  { %168 = vsyncadd [#allocation6], 4294967040  ;;  %v40_v0 = vld [vmem:[#allocation2] sm:$0xff]  ;;  %v41_v1 = vld [vmem:[#allocation2 + $0x8] sm:$0xff]  ;;  %s175_s1 = smov [#allocation7]  }
  0x27   :  { %v44_v2 = vadd.f32 1e-08, %v40_v0  ;;  %v45_v3 = vadd.f32 1e-08, %v41_v1  ;;  %v50_v4 = vsub.f32 1.0, %v40_v0  ;;  %v51_v5 = vsub.f32 1.0, %v41_v1 }
  0x28   :  { %v42_v8 = vld [vmem:[#allocation5] sm:$0xff]  ;;  %v43_v9 = vld [vmem:[#allocation5 + $0x8] sm:$0xff]  ;;  %s76_s6 = sshll.u32 %s175_s1, 4  ;;  %s77_s6 = int_to_ptr.vmem [resolvable:$true] %s76_s6 }
  0x29   :  { %91 = vlog2.f32 %v44_v2  ;;  %v52_v6 = vadd.f32 1e-08, %v50_v4  ;;  %v53_v7 = vadd.f32 1e-08, %v51_v5  ;;  %v58_v10 = vsub.f32 0.0, %v42_v8  ;;  %s143_s7 = scalar_lea.vmem %s77_s6, 128  ;;  %p148_p3 = scmp.lt.s32.totalorder %s77_s6, %s77_s6 }
  0x2a   :  { %93 = vlog2.f32 %v45_v3  ;;  %v59_v12 = vsub.f32 0.0, %v43_v9  ;;  %v62_v15 = vsub.f32 1.0, %v42_v8  ;;  %v63_v18 = vsub.f32 1.0, %v43_v9  ;;  %p144_p2 = scmp.ne.s32.totalorder %s77_s6, %s143_s7  ;;  %p149_p4 = scmp.lt.s32.totalorder %s143_s7, %s143_s7 }
  0x2b   :  { %95 = vlog2.f32 %v52_v6 }
  0x2c   :  { %97 = vlog2.f32 %v53_v7  ;;  %p150_p5 = por %p149_p4, %p148_p3 }
  0x2e   :  { %p151_p6 = pnand %p150_p5, %p144_p2 }
  0x33   :  { %v92_v11 = vpop.eup %91 }
  0x34   :  { %v94_v13 = vpop.eup %93  ;;  %v47_v14 = vmul.f32 0.6931472, %v92_v11 }
  0x35   :  { %v96_v16 = vpop.eup %95  ;;  %v49_v17 = vmul.f32 0.6931472, %v94_v13 }
  0x36   :  { %v98_v19 = vpop.eup %97  ;;  %v55_v20 = vmul.f32 0.6931472, %v96_v16  ;;  %v60_v21 = vmul.f32 %v58_v10, %v47_v14 }
  0x37   :  { %v57_v22 = vmul.f32 0.6931472, %v98_v19  ;;  %v61_v23 = vmul.f32 %v59_v12, %v49_v17 }
  0x38   :  { %v64_v24 = vmul.f32 %v62_v15, %v55_v20 }
  0x39   :  { %v65_v25 = vmul.f32 %v63_v18, %v57_v22 }
  0x3a   :  { %v66_v26 = vsub.f32 %v60_v21, %v64_v24 }
  0x3b   :  { %v67_v27 = vsub.f32 %v61_v23, %v65_v25 }
  0x3d   :  { %v68_v28 = vadd.f32 %v67_v27, %v66_v26 }
  0x3f   :  { %69 = vst [vmem:[#allocation7] sm:$0xff] %v68_v28 }
  0x40   :  { %154 = shalt.err (!%p151_p6)
}
  0x41   :  { %s155_s10 = scalar_lea.hbm %s229_s2, 128 }
  0x42   :  { %p156_p7 = scmp.ne.s32.totalorder %s229_s2, %s155_s10  ;;  %p159_p8 = scmp.lt.u32.totalorder %s155_s10, %s229_s2 }
  0x44   :  { %p161_p9 = pnand %p159_p8, %p156_p7 }
  0x46   :  { %164 = shalt.err (!%p161_p9)
}
  0x47   :  { %79 = dma.vmem_to_hbm [thread:$0]  %s77_s6, 128, %s229_s2, [#allocation4]  }
  0x48   :  { %169 = dma.done.wait [#allocation4], 128  }
  0x49   :  { %170 = vsyncadd [#allocation4], 4294967168 }
  0x4a   :  { %83 = vsyncpa [#allocation3], 1 }
  0x4b   :  { %84 = vsyncpa [#allocation6], 1 }
  0x4c   :  { %85 = vsyncpa [#allocation4], 1 }

</bundles_post_ra>
